<compile_context>
chip_gen: v7x
topology: tpu7x:2x2x1
jax: 0.10.0
libtpu: 0.0.40
codegen_flags: <defaults>
</compile_context>

<pallas_src>
import jax
import jax.numpy as jnp
from jax.experimental import pallas as pl
from jax.experimental.pallas import tpu as pltpu


_NEG_SLOPE = 0.01


def _leaky_relu(x, negative_slope=_NEG_SLOPE):
    return jnp.where(x > 0, x, negative_slope * x)


def _critic_kernel(xT_ref, w1_ref, b1_ref, w2_ref, b2_ref, oT_ref):
    # xT_ref: (24, TILE_B)   w1_ref: (12, 24)   b1_ref: (12, 1)
    # w2_ref: (12, 1)        b2_ref: (1, 1)     oT_ref: (1, TILE_B)
    xT = xT_ref[...]

    # Layer 1 on the MXU: hT = W1 @ xT  -> (12, TILE_B); batch on the lane axis,
    # f32 accumulation.
    hT = jnp.dot(w1_ref[...], xT, preferred_element_type=jnp.float32) + b1_ref[...]
    hT = _leaky_relu(hT)

    # Layer 2 (contraction 12 -> 1) on the VPU + a sublane reduce (XLU):
    # avoids an MXU round trip whose result would be only 1 row wide.
    yT = jnp.sum(hT * w2_ref[...], axis=0, keepdims=True) + b2_ref[...]
    oT_ref[...] = _leaky_relu(yT).astype(oT_ref.dtype)


def _round_up(n, m):
    return ((n + m - 1) // m) * m


def critic_forward(x, w1, b1, w2, b2, *, max_tile_b=2048):
    """Forward pass of _Critic.

    x:  (B, 24) float32
    w1: (12, 24), b1: (12,), w2: (1, 12), b2: (1,)   -- PyTorch nn.Linear layouts.
    returns (B, 1) float32.
    """
    B, in_f = x.shape
    assert in_f == 24, x.shape

    # Tile the batch axis in 128-lane multiples; pad the tail tile with zeros
    # (padded columns are discarded after the kernel, so no masking is needed).
    b128 = _round_up(B, 128)
    tile_b = min(max_tile_b, b128)
    b_pad = _round_up(B, tile_b)

    # Transposed, lane-dense layout: batch on lanes, features on sublanes.
    xT = jnp.pad(x.T.astype(jnp.float32), ((0, 0), (0, b_pad - B)))  # (24, b_pad)
    w1f = w1.astype(jnp.float32)                                     # (12, 24)
    b1c = b1.reshape(12, 1).astype(jnp.float32)                      # (12, 1)
    w2c = w2.reshape(12, 1).astype(jnp.float32)                      # (12, 1) column
    b2c = b2.reshape(1, 1).astype(jnp.float32)                       # (1, 1)

    grid = (b_pad // tile_b,)

    def resident(shape):
        # Weights/biases: one full block, same block every grid step -> stays
        # resident in VMEM instead of being re-DMA'd per iteration.
        return pl.BlockSpec(shape, lambda i, _n=len(shape): (0,) * _n)

    yT = pl.pallas_call(
        _critic_kernel,
        out_shape=jax.ShapeDtypeStruct((1, b_pad), jnp.float32),
        grid_spec=pltpu.PrefetchScalarGridSpec(
            num_scalar_prefetch=0,
            grid=grid,
            in_specs=[
                pl.BlockSpec((24, tile_b), lambda i: (0, i)),  # x tile, pipelined
                resident((12, 24)),
                resident((12, 1)),
                resident((12, 1)),
                resident((1, 1)),
            ],
            out_specs=pl.BlockSpec((1, tile_b), lambda i: (0, i)),
        ),
        compiler_params=pltpu.CompilerParams(
            dimension_semantics=("parallel",),  # shard batch across TCs on v7x
        ),
    )(xT, w1f, b1c, w2c, b2c)

    return yT[0, :B].reshape(B, 1)


def init_params(key):
    """Deterministic init matching the PyTorch module's parameter shapes/layouts.

    fc1.weight (12, 24), fc1.bias (12,), fc2.weight (1, 12), fc2.bias (1,),
    uniform(-1/sqrt(fan_in), 1/sqrt(fan_in)) like torch's default Linear init.
    """
    k1, k2, k3, k4 = jax.random.split(key, 4)
    bound1 = 1.0 / jnp.sqrt(24.0)
    bound2 = 1.0 / jnp.sqrt(12.0)
    w1 = jax.random.uniform(k1, (12, 24), jnp.float32, -bound1, bound1)
    b1 = jax.random.uniform(k2, (12,), jnp.float32, -bound1, bound1)
    w2 = jax.random.uniform(k3, (1, 12), jnp.float32, -bound2, bound2)
    b2 = jax.random.uniform(k4, (1,), jnp.float32, -bound2, bound2)
    return w1, b1, w2, b2


def reference_forward(x, w1, b1, w2, b2):
    h = _leaky_relu(x @ w1.T + b1)
    return _leaky_relu(h @ w2.T + b2)


if __name__ == "__main__":
    key = jax.random.PRNGKey(0)
    kx, kx2, kp = jax.random.split(key, 3)
    w1, b1, w2, b2 = init_params(kp)

    # Small batch (matches the nn.Module spec: features = 24 -> 12 -> 1).
    B = 8
    x = jax.random.normal(kx, (B, 24), jnp.float32)
    out = jax.block_until_ready(critic_forward(x, w1, b1, w2, b2))
    ref = reference_forward(x, w1, b1, w2, b2)
    assert out.shape == (B, 1), out.shape
    assert jnp.allclose(out, ref, atol=1e-5, rtol=1e-5), (out, ref)

    # Second check: batch not a multiple of the tile, multi-step grid
    # (exercises the padded tail tile and the resident-weight index maps).
    B2 = 300
    x2 = jax.random.normal(kx2, (B2, 24), jnp.float32)
    out2 = jax.block_until_ready(critic_forward(x2, w1, b1, w2, b2, max_tile_b=128))
    ref2 = reference_forward(x2, w1, b1, w2, b2)
    assert out2.shape == (B2, 1), out2.shape
    assert jnp.allclose(out2, ref2, atol=1e-5, rtol=1e-5)

    print("KERNEL_OK")
</pallas_src>

<mosaic_0001>
module attributes {stable_mosaic.version = 11 : i64} {
  func.func @_critic_kernel(%arg0: i32, %arg1: memref<24x128xf32, #tpu.memory_space<vmem>>, %arg2: memref<12x24xf32, #tpu.memory_space<vmem>>, %arg3: memref<12x1xf32, #tpu.memory_space<vmem>>, %arg4: memref<12x1xf32, #tpu.memory_space<vmem>>, %arg5: memref<1x1xf32, #tpu.memory_space<vmem>>, %arg6: memref<1x128xf32, #tpu.memory_space<vmem>>) attributes {dimension_semantics = [#tpu.dimension_semantics<parallel>], iteration_bounds = array<i64: 1>, scalar_prefetch = 0 : i64, scratch_operands = 0 : i64, tpu.core_type = #tpu.core_type<tc>, window_params = [{transform_indices = @transform_0, window_bounds = array<i64: 24, 128>}, {pipeline_mode = #tpu.pipeline_mode<synchronous>, transform_indices = @transform_1, window_bounds = array<i64: 12, 24>}, {pipeline_mode = #tpu.pipeline_mode<synchronous>, transform_indices = @transform_2, window_bounds = array<i64: 12, 1>}, {pipeline_mode = #tpu.pipeline_mode<synchronous>, transform_indices = @transform_3, window_bounds = array<i64: 12, 1>}, {pipeline_mode = #tpu.pipeline_mode<synchronous>, transform_indices = @transform_4, window_bounds = array<i64: 1, 1>}, {transform_indices = @transform_5, window_bounds = array<i64: 1, 128>}]} {
    %c0 = arith.constant 0 : index
    %c0_0 = arith.constant 0 : index
    %0 = vector.load %arg1[%c0, %c0_0] : memref<24x128xf32, #tpu.memory_space<vmem>>, vector<24x128xf32>
    %c0_1 = arith.constant 0 : index
    %c0_2 = arith.constant 0 : index
    %1 = vector.load %arg2[%c0_1, %c0_2] : memref<12x24xf32, #tpu.memory_space<vmem>>, vector<12x24xf32>
    %cst = arith.constant dense<0.000000e+00> : vector<12x128xf32>
    %2 = tpu.matmul %1, %0, %cst {dimension_numbers = #tpu.dot_dimension_numbers<[1], [0], [0], [1], [0, 0, 1, 1], [], []>} : vector<12x24xf32>, vector<24x128xf32>, vector<12x128xf32> -> vector<12x128xf32>
    %c0_3 = arith.constant 0 : index
    %c0_4 = arith.constant 0 : index
    %3 = vector.load %arg3[%c0_3, %c0_4] : memref<12x1xf32, #tpu.memory_space<vmem>>, vector<12x1xf32>
    %4 = vector.broadcast %3 : vector<12x1xf32> to vector<12x128xf32>
    %5 = arith.addf %2, %4 : vector<12x128xf32>
    %cst_5 = arith.constant 0.000000e+00 : f32
    %6 = vector.broadcast %cst_5 : f32 to vector<12x128xf32>
    %7 = arith.cmpf ogt, %5, %6 : vector<12x128xf32>
    %cst_6 = arith.constant 0.00999999977 : f32
    %8 = vector.broadcast %cst_6 : f32 to vector<12x128xf32>
    %9 = arith.mulf %8, %5 : vector<12x128xf32>
    %10 = arith.select %7, %5, %9 : vector<12x128xi1>, vector<12x128xf32>
    %c0_7 = arith.constant 0 : index
    %c0_8 = arith.constant 0 : index
    %11 = vector.load %arg4[%c0_7, %c0_8] : memref<12x1xf32, #tpu.memory_space<vmem>>, vector<12x1xf32>
    %12 = vector.broadcast %11 : vector<12x1xf32> to vector<12x128xf32>
    %13 = arith.mulf %10, %12 : vector<12x128xf32>
    %cst_9 = arith.constant dense<0.000000e+00> : vector<128xf32>
    %14 = vector.multi_reduction <add>, %13, %cst_9 [0] : vector<12x128xf32> to vector<128xf32>
    %15 = vector.shape_cast %14 : vector<128xf32> to vector<1x128xf32>
    %c0_10 = arith.constant 0 : index
    %c0_11 = arith.constant 0 : index
    %16 = vector.load %arg5[%c0_10, %c0_11] : memref<1x1xf32, #tpu.memory_space<vmem>>, vector<1x1xf32>
    %17 = vector.broadcast %16 : vector<1x1xf32> to vector<1x128xf32>
    %18 = arith.addf %15, %17 : vector<1x128xf32>
    %cst_12 = arith.constant 0.000000e+00 : f32
    %19 = vector.broadcast %cst_12 : f32 to vector<1x128xf32>
    %20 = arith.cmpf ogt, %18, %19 : vector<1x128xf32>
    %cst_13 = arith.constant 0.00999999977 : f32
    %21 = vector.broadcast %cst_13 : f32 to vector<1x128xf32>
    %22 = arith.mulf %21, %18 : vector<1x128xf32>
    %23 = arith.select %20, %18, %22 : vector<1x128xi1>, vector<1x128xf32>
    %c0_14 = arith.constant 0 : index
    %c0_15 = arith.constant 0 : index
    %24 = vector.load %arg6[%c0_14, %c0_15] : memref<1x128xf32, #tpu.memory_space<vmem>>, vector<1x128xf32>
    tpu.vector_store %arg6[%c0_14, %c0_15], %23 {strides = array<i32>} : memref<1x128xf32, #tpu.memory_space<vmem>>, vector<1x128xf32>,
    return
  }
  func.func @transform_0(%arg0: i32) -> (i32, i32) {
    %c0_i32 = arith.constant 0 : i32
    %c0_i32_0 = arith.constant 0 : i32
    return %c0_i32, %arg0 : i32, i32
  }
  func.func @transform_1(%arg0: i32) -> (i32, i32) {
    %c0_i32 = arith.constant 0 : i32
    %c0_i32_0 = arith.constant 0 : i32
    %c0_i32_1 = arith.constant 0 : i32
    return %c0_i32, %c0_i32_0 : i32, i32
  }
  func.func @transform_2(%arg0: i32) -> (i32, i32) {
    %c0_i32 = arith.constant 0 : i32
    %c0_i32_0 = arith.constant 0 : i32
    %c0_i32_1 = arith.constant 0 : i32
    return %c0_i32, %c0_i32_0 : i32, i32
  }
  func.func @transform_3(%arg0: i32) -> (i32, i32) {
    %c0_i32 = arith.constant 0 : i32
    %c0_i32_0 = arith.constant 0 : i32
    %c0_i32_1 = arith.constant 0 : i32
    return %c0_i32, %c0_i32_0 : i32, i32
  }
  func.func @transform_4(%arg0: i32) -> (i32, i32) {
    %c0_i32 = arith.constant 0 : i32
    %c0_i32_0 = arith.constant 0 : i32
    %c0_i32_1 = arith.constant 0 : i32
    return %c0_i32, %c0_i32_0 : i32, i32
  }
  func.func @transform_5(%arg0: i32) -> (i32, i32) {
    %c0_i32 = arith.constant 0 : i32
    %c0_i32_0 = arith.constant 0 : i32
    return %c0_i32, %arg0 : i32, i32
  }
}

</mosaic_0001>

<bundles_post_ra>
// kernel: tpu_custom_call.1
= control target key start
LH: loop header
LB: loop body
LE: loop exit
PB: predicated region body
PF: predicated region fallthrough
CT: control target
= control target key end

     0   :  { %s304_s0 = inlined_call_operand.vmem [shape: f32[24,128], index: 0, kind: input, shape index: {}]   ;;  %s305_s1 = inlined_call_operand.vmem [shape: f32[12,24], index: 1, kind: input, shape index: {}]   ;;  %s306_s2 = inlined_call_operand.vmem [shape: f32[12,1], index: 2, kind: input, shape index: {}]   ;;  %s307_s3 = inlined_call_operand.vmem [shape: f32[12,1], index: 3, kind: input, shape index: {}]   ;;  %s308_s4 = inlined_call_operand.<no memory space> [shape: f32[1,1], index: 4, kind: input, shape index: {}]   ;;  %s309_s5 = inlined_call_operand.hbm [shape: f32[1,128], index: 5, kind: output, shape index: {}]  }
   0x1   :  { %v10_v0 = vstv %s308_s4 }
   0x2   :  { %11 = vst [vmem:[#allocation2] sm:$0x1] %v10_v0 }
   0x3   :  { %v23_v1 = vld [vmem:[%s304_s0] sm:$0xff]  ;;  %v24_v2 = vld [vmem:[%s304_s0 + $0x8] sm:$0xff]  ;;  %vm40_vm0 = vcmask 195584   ;;  %v228_v5 = vmov 0   ;;  %v25_v7 = vld [vmem:[%s304_s0 + $0x10] sm:$0xff] }
   0x4   :  { %v196_v3 = vpack.c.bf16 %v24_v2, %v23_v1  ;;  %v26_v4 = vld [vmem:[%s305_s1] sm:$0xff]  ;;  %202 = vset.pattern.permute.xlu0 %v228_v5  ;;  %v29_v6 = vld [vmem:[%s306_s2 + $0x8] sm:$0xf]  ;;  %203 = vset.pattern.permute.xlu1 %v228_v5 }
   0x5   :  { %193 = vmatprep.mubr.msk.f32.mxu0 %vm40_vm0, %v26_v4  ;;  %37 = vperm.xlu0 %202, %v29_v6   ;;  %v129_v8 = vld [vmem:[%s307_s3 + $0x8] sm:$0xf]  ;;  %v28_v9 = vld [vmem:[%s306_s2] sm:$0xff] }
   0x6   :  { %197 = vmatprep.subr.bf16.mxu0 %v196_v3  ;;  %137 = vperm.xlu1 %203, %v129_v8  }
   0x7   :  { %12 = vsyncpa [#allocation4], 0  ;;  %199 = vmatpush3.bf16.msra.mxu0 %v196_v3  ;;  %v128_v10 = vld [vmem:[%s307_s3] sm:$0xff]  ;;  %v27_v11 = vld [vmem:[%s305_s1 + $0x8] sm:$0xf]  ;;  %vm142_vm3 = vcmask 1043456   ;;  %v157_v28 = vlaneseq }
   0x8   :  { %191 = vmatprep.subr.mxu0 %v25_v7  ;;  %s229_s1 = smov [#allocation3]  }
   0x9   :  { %32 = vperm.xlu0 %202, %v28_v9   ;;  %v151_v12 = vld [vmem:[#allocation2] sm:$0x1]  ;;  %v158_v31 = vshrl.u32 %v157_v28, 7  ;;  %s172_s2 = sshll.u32 %s229_s1, 4  ;;  %s173_s2 = int_to_ptr.vmem [resolvable:$true] %s172_s2 }
   0xa   :  { %132 = vperm.xlu1 %203, %v128_v10   ;;  %s204_s3 = scalar_lea.vmem %s173_s2, 16  ;;  %s208_s11 = scalar_lea.vmem %s173_s2, 32 }
   0xb   :  { %192 = vmatpush3.msra.mxu0 %v25_v7  ;;  %v159_v34 = vsub.s32 0, %v158_v31  ;;  %p205_p0 = scmp.ne.s32.totalorder %s173_s2, %s204_s3  ;;  %p209_p1 = scmp.lt.s32.totalorder %s173_s2, %s173_s2 }
   0xc   :  { %194 = vmatmul.mubr.msk.f32.vlgmr.msra.gmra.mrb[0].mxu0 %vm40_vm0, %v27_v11  ;;  %p210_p2 = scmp.lt.s32.totalorder %s208_s11, %s204_s3 }
   0xd   :  { %154 = vperm.xlu0 %202, %v151_v12  }
   0xe   :  { %p211_p3 = por %p210_p2, %p209_p1 }
  0x10   :  { %p212_p4 = pnand %p211_p3, %p205_p0 }
  0x84   :  { %v38_v13 = vpop.permute.xlu0 %37 }
  0x85   :  { %v138_v14 = vpop.permute.xlu1 %137 }
  0x88   :  { %v33_v16 = vpop.permute.xlu0 %32 }
  0x89   :  { %v133_v23 = vpop.permute.xlu1 %132 }
  0x8c   :  { %v155_v36 = vpop.permute.xlu0 %154 }
  0x8d   :  { %v160_v38 = vrot.slane %v155_v36, %v159_v34 }
  0xdf   :  { %v195_v15 = vpop.f32.mrb[0].mxu0 }
  0xe0   :  { %v119_v17 = vadd.f32 %v195_v15, %v38_v13  ;;  %v113_v18 = vpop.f32.mrb[1].mxu0 }
  0xe1   :  { %v114_v19 = vadd.f32 %v113_v18, %v33_v16 }
  0xe2   :  { %vm123_vm1 = vcmp.gt.f32.partialorder %v119_v17, 0.0  ;;  %v125_v20 = vmul.f32 0.01, %v119_v17 }
  0xe3   :  { %v124_v21 = vmul.f32 0.01, %v114_v19  ;;  %vm122_vm2 = vcmp.gt.f32.partialorder %v114_v19, 0.0 }
  0xe4   :  { %v127_v22 = vsel %vm123_vm1, %v119_v17, %v125_v20 }
  0xe5   :  { %v126_v24 = vsel %vm122_vm2, %v114_v19, %v124_v21  ;;  %v141_v25 = vmul.f32 %v138_v14, %v127_v22 }
  0xe6   :  { %v140_v26 = vmul.f32 %v133_v23, %v126_v24 }
  0xe7   :  { %v143_v27 = vsel %vm142_vm3, %v141_v25, 0.0 }
  0xe8   :  { %v144_v29 = vadd.f32 %v143_v27, %v140_v26 }
  0xea   :  { %v145_v30 = vrot.slane %v144_v29, 4 }
  0xec   :  { %v146_v32 = vadd.f32 %v145_v30, %v144_v29 }
  0xee   :  { %v147_v33 = vrot.slane %v146_v32, 2 }
  0xf0   :  { %v148_v35 = vadd.f32 %v147_v33, %v146_v32 }
  0xf2   :  { %v149_v37 = vrot.slane %v148_v35, 1 }
  0xf4   :  { %v150_v39 = vadd.f32 %v149_v37, %v148_v35 }
  0xf6   :  { %v161_v40 = vadd.f32 %v160_v38, %v150_v39 }
  0xf8   :  { %vm162_vm4 = vcmp.gt.f32.partialorder %v161_v40, 0.0  ;;  %v163_v41 = vmul.f32 0.01, %v161_v40 }
  0xfa   :  { %v164_v42 = vsel %vm162_vm4, %v161_v40, %v163_v41 }
  0xfb   :  { %165 = vst [vmem:[#allocation3] sm:$0x1] %v164_v42 }
  0xfc   :  { %215 = shalt.err (!%p212_p4)
}
  0xfd   :  { %s216_s14 = scalar_lea.hbm %s309_s5, 16 }
  0xfe   :  { %p217_p5 = scmp.ne.s32.totalorder %s309_s5, %s216_s14  ;;  %p220_p6 = scmp.lt.u32.totalorder %s216_s14, %s309_s5 }
 0x100   :  { %p222_p7 = pnand %p220_p6, %p217_p5 }
 0x102   :  { %225 = shalt.err (!%p222_p7)
}
 0x103   :  { %175 = dma.vmem_to_hbm [thread:$0]  %s173_s2, 16, %s309_s5, [#allocation4]  }
 0x104   :  { %226 = dma.done.wait [#allocation4], 16  }
 0x105   :  { %227 = vsyncadd [#allocation4], 4294967280 }
 0x106   :  { %179 = vsyncpa [#allocation4], 1 }

</bundles_post_ra>
